<compile_context>
chip_gen: v5e
topology: v5e:2x2
jax: 0.10.0
libtpu: 0.0.40
codegen_flags: <defaults>
</compile_context>

<pallas_src>
import jax
import jax.numpy as jnp
import numpy as np
from jax.experimental import pallas as pl
from jax.experimental.pallas import tpu as pltpu


# ----------------------------------------------------------------------------- kernel
def net_kernel(p_ref, wc_ref, w1_ref, w2_ref, out_ref):
    # p_ref : (4, TB, 512)  im2col patches, one slab per pool-window offset,
    #                       lane 432 == 1.0 (bias lane), lanes 433.. == 0
    # wc_ref: (512, 256)    block-structured conv weight (+bias row 432),
    #                       output col layout = PyTorch flatten order c*16+s,
    #                       col 160 produces a constant 1.0
    # w1_ref: (256, 128)    fc1 weight (+bias row 160), col 120 produces 1.0
    # w2_ref: (128, 128)    fc2 weight (+bias row 120), cols 81.. masked to -1e30
    # out_ref: (TB, 128)    softmax probabilities (cols 81.. ~ 0)
    tb = p_ref.shape[1]

    # --- conv (single matmul over all 4 pool offsets) ------------------------
    p = p_ref[...].reshape(4 * tb, 512)                      # cheap leading-dim merge
    conv = jnp.dot(p, wc_ref[...], preferred_element_type=jnp.float32)  # (4*TB, 256)
    conv = conv.reshape(4, tb, 256)

    # --- 2x2 max-pool (elementwise max of the 4 offset slabs) + relu ---------
    pooled = jnp.maximum(jnp.maximum(conv[0], conv[1]),
                         jnp.maximum(conv[2], conv[3]))       # (TB, 256)
    pooled = jnp.maximum(pooled, 0.0)                         # lane 160 stays 1.0

    # --- fc1 + relu (single matmul; bias folded via lane 160) ----------------
    h1 = jnp.dot(pooled, w1_ref[...], preferred_element_type=jnp.float32)  # (TB, 128)
    h1 = jnp.maximum(h1, 0.0)                                 # lane 120 stays 1.0

    # --- fc2 (bias folded via lane 120) + softmax over 128 lanes -------------
    h2 = jnp.dot(h1, w2_ref[...], preferred_element_type=jnp.float32)      # (TB, 128)
    m = jnp.max(h2, axis=-1, keepdims=True)
    e = jnp.exp(h2 - m)
    out_ref[...] = e * pl.reciprocal(jnp.sum(e, axis=-1, keepdims=True), approx=False)


# ----------------------------------------------------------------------------- glue
def _prep_weights(params):
    """Pack the PyTorch-shaped parameters into the 3 kernel weight matrices."""
    Wc, bc, W1, b1, W2, b2 = params
    f32 = jnp.float32

    # conv: row = s*27 + k (k = c_in*9 + kh*3 + kw), col = c_out*16 + s.
    w3 = Wc.reshape(10, 27).T.astype(f32)                       # (27, 10)  [k, c]
    eye16 = jnp.eye(16, dtype=f32)
    blk = w3[None, :, :, None] * eye16[:, None, None, :]        # (16, 27, 10, 16)
    wc_big = blk.reshape(432, 160)
    wc_big = jnp.concatenate([wc_big, jnp.zeros((432, 96), f32)], axis=1)   # (432, 256)
    bias_row = jnp.concatenate([jnp.repeat(bc.astype(f32), 16),             # conv bias
                                jnp.array([1.0], f32),                      # -> lane 160 == 1
                                jnp.zeros((95,), f32)])                     # (256,)
    wc_big = jnp.concatenate([wc_big, bias_row[None, :],
                              jnp.zeros((79, 256), f32)], axis=0)           # (512, 256)

    # fc1: rows 0..159 = W1^T (input already in PyTorch flatten order),
    #      row 160 = [b1, 1, 0...] (bias + constant-1 feed for fc2 bias).
    w1_big = jnp.zeros((256, 128), f32)
    w1_big = w1_big.at[:160, :120].set(W1.T.astype(f32))
    w1_big = w1_big.at[160, :120].set(b1.astype(f32))
    w1_big = w1_big.at[160, 120].set(1.0)

    # fc2: rows 0..119 = W2^T, row 120 = [b2, -1e30 pad mask].
    w2_big = jnp.zeros((128, 128), f32)
    w2_big = w2_big.at[:120, :81].set(W2.T.astype(f32))
    w2_big = w2_big.at[120, :81].set(b2.astype(f32))
    w2_big = w2_big.at[120, 81:].set(-1e30)
    return wc_big, w1_big, w2_big


def _im2col(xb):
    """xb: (B, 3, 10, 10) -> (4, B, 512) patch slabs (lane 432 = 1, rest pad 0)."""
    xb = xb.astype(jnp.float32)
    B = xb.shape[0]
    cols = [xb[:, :, kh:kh + 8, kw:kw + 8] for kh in range(3) for kw in range(3)]
    pat = jnp.stack(cols, axis=2).reshape(B, 27, 8, 8)          # k = c*9 + kh*3 + kw
    groups = []
    for di in range(2):
        for dj in range(2):
            g = pat[:, :, di::2, dj::2].reshape(B, 27, 16)      # s = i*4 + j
            groups.append(jnp.transpose(g, (0, 2, 1)).reshape(B, 432))  # lane = s*27 + k
    p = jnp.stack(groups, axis=0)                               # (4, B, 432)
    ones = jnp.ones((4, B, 1), jnp.float32)
    pad = jnp.zeros((4, B, 512 - 433), jnp.float32)
    return jnp.concatenate([p, ones, pad], axis=-1)             # (4, B, 512)


@jax.jit
def net_forward_batched(xb, params):
    """xb: (B, 3, 10, 10) float32 (NCHW, like PyTorch). Returns (B, 81) softmax."""
    B = xb.shape[0]
    wc_big, w1_big, w2_big = _prep_weights(params)
    patches = _im2col(xb)                                       # (4, B, 512)

    # Tile the batch: 256 rows/step fills the v6e/v7x 256-wide MXU
    # (on v5e a 256-row tile is simply two MXU passes).
    if B >= 256:
        TB = 256
        Bp = pl.cdiv(B, TB) * TB
    else:
        Bp = pl.cdiv(B, 8) * 8
        TB = Bp
    if Bp != B:
        patches = jnp.pad(patches, ((0, 0), (0, Bp - B), (0, 0)))

    out = pl.pallas_call(
        net_kernel,
        out_shape=jax.ShapeDtypeStruct((Bp, 128), jnp.float32),
        grid=(Bp // TB,),
        in_specs=[
            pl.BlockSpec((4, TB, 512), lambda i: (0, i, 0)),
            pl.BlockSpec((512, 256), lambda i: (0, 0)),   # resident across grid steps
            pl.BlockSpec((256, 128), lambda i: (0, 0)),
            pl.BlockSpec((128, 128), lambda i: (0, 0)),
        ],
        out_specs=pl.BlockSpec((TB, 128), lambda i: (i, 0)),
        compiler_params=pltpu.CompilerParams(dimension_semantics=("parallel",)),
    )(patches, wc_big, w1_big, w2_big)
    return out[:B, :81]


def net_forward(x, params):
    """x: (1, 3, 10, 10) float32 (original module API). Returns (81,) softmax."""
    return net_forward_batched(x, params)[0]


# ----------------------------------------------------------------------------- reference
def net_reference_batched(xb, params):
    Wc, bc, W1, b1, W2, b2 = params
    conv = jax.lax.conv_general_dilated(
        xb.astype(jnp.float32), Wc, window_strides=(1, 1), padding="VALID",
        dimension_numbers=("NCHW", "OIHW", "NCHW"),
        precision=jax.lax.Precision.HIGHEST) + bc[None, :, None, None]     # (B,10,8,8)
    pooled = jax.lax.reduce_window(conv, -jnp.inf, jax.lax.max,
                                   (1, 1, 2, 2), (1, 1, 2, 2), "VALID")    # (B,10,4,4)
    h = jnp.maximum(pooled, 0.0).reshape(xb.shape[0], 160)                 # torch view(160)
    h1 = jnp.maximum(
        jnp.dot(h, W1.T, precision=jax.lax.Precision.HIGHEST) + b1, 0.0)
    logits = jnp.dot(h1, W2.T, precision=jax.lax.Precision.HIGHEST) + b2
    return jax.nn.softmax(logits, axis=-1)                                 # (B,81)


# ----------------------------------------------------------------------------- main
if __name__ == "__main__":
    key = jax.random.PRNGKey(0)
    ks = jax.random.split(key, 8)

    # Deterministic synthetic parameters (same shapes as the PyTorch module).
    Wc = 0.1 * jax.random.normal(ks[0], (10, 3, 3, 3), jnp.float32)
    bc = 0.1 * jax.random.normal(ks[1], (10,), jnp.float32)
    W1 = 0.1 * jax.random.normal(ks[2], (120, 160), jnp.float32)
    b1 = 0.1 * jax.random.normal(ks[3], (120,), jnp.float32)
    W2 = 0.1 * jax.random.normal(ks[4], (81, 120), jnp.float32)
    b2 = 0.1 * jax.random.normal(ks[5], (81,), jnp.float32)
    params = (Wc, bc, W1, b1, W2, b2)

    # Single position (the original module API) + a small batch of positions.
    x1 = jax.random.normal(ks[6], (1, 3, 10, 10), jnp.float32)
    xb = jax.random.normal(ks[7], (64, 3, 10, 10), jnp.float32)

    out1 = jax.block_until_ready(net_forward(x1, params))
    ref1 = np.asarray(net_reference_batched(x1, params)[0])
    assert out1.shape == (81,), out1.shape
    assert np.allclose(np.asarray(out1), ref1, rtol=1e-3, atol=1e-4), (
        np.max(np.abs(np.asarray(out1) - ref1)))
    assert np.isclose(float(jnp.sum(out1)), 1.0, atol=1e-4)

    outb = jax.block_until_ready(net_forward_batched(xb, params))
    refb = np.asarray(net_reference_batched(xb, params))
    assert outb.shape == (64, 81), outb.shape
    assert np.allclose(np.asarray(outb), refb, rtol=1e-3, atol=1e-4), (
        np.max(np.abs(np.asarray(outb) - refb)))
    assert np.allclose(np.asarray(jnp.sum(outb, axis=-1)), 1.0, atol=1e-4)

    print("KERNEL_OK")
</pallas_src>

<mosaic_0001>
module attributes {stable_mosaic.version = 11 : i64} {
  func.func @net_kernel(%arg0: i32, %arg1: memref<4x8x512xf32, #tpu.memory_space<vmem>>, %arg2: memref<512x256xf32, #tpu.memory_space<vmem>>, %arg3: memref<256x128xf32, #tpu.memory_space<vmem>>, %arg4: memref<128x128xf32, #tpu.memory_space<vmem>>, %arg5: memref<8x128xf32, #tpu.memory_space<vmem>>) attributes {dimension_semantics = [#tpu.dimension_semantics<parallel>], iteration_bounds = array<i64: 1>, scalar_prefetch = 0 : i64, scratch_operands = 0 : i64, tpu.core_type = #tpu.core_type<tc>, window_params = [{transform_indices = @transform_0, window_bounds = array<i64: 4, 8, 512>}, {pipeline_mode = #tpu.pipeline_mode<synchronous>, transform_indices = @transform_1, window_bounds = array<i64: 512, 256>}, {pipeline_mode = #tpu.pipeline_mode<synchronous>, transform_indices = @transform_2, window_bounds = array<i64: 256, 128>}, {pipeline_mode = #tpu.pipeline_mode<synchronous>, transform_indices = @transform_3, window_bounds = array<i64: 128, 128>}, {transform_indices = @transform_4, window_bounds = array<i64: 8, 128>}]} {
    %c0 = arith.constant 0 : index
    %c0_0 = arith.constant 0 : index
    %c0_1 = arith.constant 0 : index
    %0 = vector.load %arg1[%c0, %c0_0, %c0_1] : memref<4x8x512xf32, #tpu.memory_space<vmem>>, vector<4x8x512xf32>
    %1 = vector.shape_cast %0 : vector<4x8x512xf32> to vector<32x512xf32>
    %c0_2 = arith.constant 0 : index
    %c0_3 = arith.constant 0 : index
    %2 = vector.load %arg2[%c0_2, %c0_3] : memref<512x256xf32, #tpu.memory_space<vmem>>, vector<512x256xf32>
    %cst = arith.constant dense<0.000000e+00> : vector<32x256xf32>
    %3 = tpu.matmul %1, %2, %cst {dimension_numbers = #tpu.dot_dimension_numbers<[1], [0], [0], [1], [0, 0, 1, 1], [], []>} : vector<32x512xf32>, vector<512x256xf32>, vector<32x256xf32> -> vector<32x256xf32>
    %4 = vector.shape_cast %3 : vector<32x256xf32> to vector<4x8x256xf32>
    %5 = vector.extract_strided_slice %4 {offsets = [0, 0, 0], sizes = [1, 8, 256], strides = [1, 1, 1]} : vector<4x8x256xf32> to vector<1x8x256xf32>
    %6 = vector.shape_cast %5 : vector<1x8x256xf32> to vector<8x256xf32>
    %7 = vector.extract_strided_slice %4 {offsets = [1, 0, 0], sizes = [1, 8, 256], strides = [1, 1, 1]} : vector<4x8x256xf32> to vector<1x8x256xf32>
    %8 = vector.shape_cast %7 : vector<1x8x256xf32> to vector<8x256xf32>
    %9 = arith.maximumf %6, %8 : vector<8x256xf32>
    %10 = vector.extract_strided_slice %4 {offsets = [2, 0, 0], sizes = [1, 8, 256], strides = [1, 1, 1]} : vector<4x8x256xf32> to vector<1x8x256xf32>
    %11 = vector.shape_cast %10 : vector<1x8x256xf32> to vector<8x256xf32>
    %12 = vector.extract_strided_slice %4 {offsets = [3, 0, 0], sizes = [1, 8, 256], strides = [1, 1, 1]} : vector<4x8x256xf32> to vector<1x8x256xf32>
    %13 = vector.shape_cast %12 : vector<1x8x256xf32> to vector<8x256xf32>
    %14 = arith.maximumf %11, %13 : vector<8x256xf32>
    %15 = arith.maximumf %9, %14 : vector<8x256xf32>
    %cst_4 = arith.constant 0.000000e+00 : f32
    %16 = vector.broadcast %cst_4 : f32 to vector<8x256xf32>
    %17 = arith.maximumf %15, %16 : vector<8x256xf32>
    %c0_5 = arith.constant 0 : index
    %c0_6 = arith.constant 0 : index
    %18 = vector.load %arg3[%c0_5, %c0_6] : memref<256x128xf32, #tpu.memory_space<vmem>>, vector<256x128xf32>
    %cst_7 = arith.constant dense<0.000000e+00> : vector<8x128xf32>
    %19 = tpu.matmul %17, %18, %cst_7 {dimension_numbers = #tpu.dot_dimension_numbers<[1], [0], [0], [1], [0, 0, 1, 1], [], []>} : vector<8x256xf32>, vector<256x128xf32>, vector<8x128xf32> -> vector<8x128xf32>
    %cst_8 = arith.constant 0.000000e+00 : f32
    %20 = vector.broadcast %cst_8 : f32 to vector<8x128xf32>
    %21 = arith.maximumf %19, %20 : vector<8x128xf32>
    %c0_9 = arith.constant 0 : index
    %c0_10 = arith.constant 0 : index
    %22 = vector.load %arg4[%c0_9, %c0_10] : memref<128x128xf32, #tpu.memory_space<vmem>>, vector<128x128xf32>
    %cst_11 = arith.constant dense<0.000000e+00> : vector<8x128xf32>
    %23 = tpu.matmul %21, %22, %cst_11 {dimension_numbers = #tpu.dot_dimension_numbers<[1], [0], [0], [1], [0, 0, 1, 1], [], []>} : vector<8x128xf32>, vector<128x128xf32>, vector<8x128xf32> -> vector<8x128xf32>
    %cst_12 = arith.constant dense<0xFF800000> : vector<8xf32>
    %24 = vector.multi_reduction <maximumf>, %23, %cst_12 [1] : vector<8x128xf32> to vector<8xf32>
    %25 = vector.shape_cast %24 : vector<8xf32> to vector<8x1xf32>
    %26 = vector.broadcast %25 : vector<8x1xf32> to vector<8x128xf32>
    %27 = arith.subf %23, %26 : vector<8x128xf32>
    %28 = math.exp %27 : vector<8x128xf32>
    %cst_13 = arith.constant dense<0.000000e+00> : vector<8xf32>
    %29 = vector.multi_reduction <add>, %28, %cst_13 [1] : vector<8x128xf32> to vector<8xf32>
    %30 = vector.shape_cast %29 : vector<8xf32> to vector<8x1xf32>
    %31 = tpu.reciprocal %30 : vector<8x1xf32> -> vector<8x1xf32>
    %32 = vector.broadcast %31 : vector<8x1xf32> to vector<8x128xf32>
    %33 = arith.mulf %28, %32 : vector<8x128xf32>
    %c0_14 = arith.constant 0 : index
    %c0_15 = arith.constant 0 : index
    %34 = vector.load %arg5[%c0_14, %c0_15] : memref<8x128xf32, #tpu.memory_space<vmem>>, vector<8x128xf32>
    tpu.vector_store %arg5[%c0_14, %c0_15], %33 {strides = array<i32>} : memref<8x128xf32, #tpu.memory_space<vmem>>, vector<8x128xf32>,
    return
  }
  func.func @transform_0(%arg0: i32) -> (i32, i32, i32) {
    %c0_i32 = arith.constant 0 : i32
    %c0_i32_0 = arith.constant 0 : i32
    %c0_i32_1 = arith.constant 0 : i32
    return %c0_i32, %arg0, %c0_i32_0 : i32, i32, i32
  }
  func.func @transform_1(%arg0: i32) -> (i32, i32) {
    %c0_i32 = arith.constant 0 : i32
    %c0_i32_0 = arith.constant 0 : i32
    %c0_i32_1 = arith.constant 0 : i32
    return %c0_i32, %c0_i32_0 : i32, i32
  }
  func.func @transform_2(%arg0: i32) -> (i32, i32) {
    %c0_i32 = arith.constant 0 : i32
    %c0_i32_0 = arith.constant 0 : i32
    %c0_i32_1 = arith.constant 0 : i32
    return %c0_i32, %c0_i32_0 : i32, i32
  }
  func.func @transform_3(%arg0: i32) -> (i32, i32) {
    %c0_i32 = arith.constant 0 : i32
    %c0_i32_0 = arith.constant 0 : i32
    %c0_i32_1 = arith.constant 0 : i32
    return %c0_i32, %c0_i32_0 : i32, i32
  }
  func.func @transform_4(%arg0: i32) -> (i32, i32) {
    %c0_i32 = arith.constant 0 : i32
    %c0_i32_0 = arith.constant 0 : i32
    return %arg0, %c0_i32 : i32, i32
  }
}

</mosaic_0001>

<bundles_post_ra>
// kernel: net_forward_batched.1
= control target key start
LH: loop header
LB: loop body
LE: loop exit
PB: predicated region body
PF: predicated region fallthrough
CT: control target
= control target key end

     0   :  { %s1197_s1 = inlined_call_operand.vmem [shape: f32[512,256], index: 1, kind: input, shape index: {}]   ;;  %s1198_s0 = inlined_call_operand.vmem [shape: f32[4,8,512], index: 0, kind: input, shape index: {}]   ;;  %s1199_s2 = inlined_call_operand.vmem [shape: f32[256,128], index: 2, kind: input, shape index: {}]   ;;  %s1200_s3 = inlined_call_operand.vmem [shape: f32[128,128], index: 3, kind: input, shape index: {}]   ;;  %s1201_s4 = inlined_call_operand.vmem [shape: f32[8,128], index: 4, kind: output, shape index: {}]  }
   0x1   :  { %v127_v0 = vld [vmem:[%s1197_s1 + $0x2f0] sm:$0xff]  ;;  %v125_v1 = vld [vmem:[%s1197_s1 + $0x2e0] sm:$0xff]  ;;  %v760_v63 = vld [vmem:[%s1198_s0 + $0x18] sm:$0xff] }
   0x2   :  { %v159_v2 = vld [vmem:[%s1197_s1 + $0x3f0] sm:$0xff]  ;;  %219 = vmatpush.msra.mxu2 %v127_v0  ;;  %v157_v6 = vld [vmem:[%s1197_s1 + $0x3e0] sm:$0xff]  ;;  %v128_v0 = vld [vmem:[%s1197_s1 + $0x2f8] sm:$0xff] }
   0x3   :  { %248 = vmatpush.msra.mxu3 %v159_v2  ;;  %v63_v3 = vld [vmem:[%s1197_s1 + $0xf0] sm:$0xff]  ;;  %v61_v7 = vld [vmem:[%s1197_s1 + $0xe0] sm:$0xff] }
   0x4   :  { %v95_v4 = vld [vmem:[%s1197_s1 + $0x1f0] sm:$0xff]  ;;  %161 = vmatpush.msra.mxu0 %v63_v3  ;;  %v93_v8 = vld [vmem:[%s1197_s1 + $0x1e0] sm:$0xff]  ;;  %220 = vmatpush.msra.mxu2 %v125_v1  ;;  %v160_v1 = vld [vmem:[%s1197_s1 + $0x3f8] sm:$0xff] }
   0x5   :  { %v123_v5 = vld [vmem:[%s1197_s1 + $0x2d0] sm:$0xff]  ;;  %190 = vmatpush.msra.mxu1 %v95_v4  ;;  %249 = vmatpush.msra.mxu3 %v157_v6  ;;  %v121_v11 = vld [vmem:[%s1197_s1 + $0x2c0] sm:$0xff]  ;;  %v126_v4 = vld [vmem:[%s1197_s1 + $0x2e8] sm:$0xff] }
   0x6   :  { %v155_v9 = vld [vmem:[%s1197_s1 + $0x3d0] sm:$0xff]  ;;  %162 = vmatpush.msra.mxu0 %v61_v7  ;;  %v153_v13 = vld [vmem:[%s1197_s1 + $0x3c0] sm:$0xff]  ;;  %221 = vmatpush.msra.mxu2 %v123_v5  ;;  %v787_v6 = vld [vmem:[%s1198_s0 + $0x8] sm:$0xff] }
   0x7   :  { %v59_v10 = vld [vmem:[%s1197_s1 + $0xd0] sm:$0xff]  ;;  %191 = vmatpush.msra.mxu1 %v93_v8  ;;  %250 = vmatpush.msra.mxu3 %v155_v9  ;;  %v57_v14 = vld [vmem:[%s1197_s1 + $0xc0] sm:$0xff]  ;;  %v64_v7 = vld [vmem:[%s1197_s1 + $0xf8] sm:$0xff] }
   0x8   :  { %v91_v12 = vld [vmem:[%s1197_s1 + $0x1d0] sm:$0xff]  ;;  %v89_v15 = vld [vmem:[%s1197_s1 + $0x1c0] sm:$0xff]  ;;  %163 = vmatpush.msra.mxu0 %v59_v10  ;;  %222 = vmatpush.msra.mxu2 %v121_v11  ;;  %v96_v8 = vld [vmem:[%s1197_s1 + $0x1f8] sm:$0xff] }
   0x9   :  { %192 = vmatpush.msra.mxu1 %v91_v12  ;;  %v119_v16 = vld [vmem:[%s1197_s1 + $0x2b0] sm:$0xff]  ;;  %251 = vmatpush.msra.mxu3 %v153_v13  ;;  %v117_v20 = vld [vmem:[%s1197_s1 + $0x2a0] sm:$0xff]  ;;  %v124_v9 = vld [vmem:[%s1197_s1 + $0x2d8] sm:$0xff] }
   0xa   :  { %v151_v17 = vld [vmem:[%s1197_s1 + $0x3b0] sm:$0xff]  ;;  %164 = vmatpush.msra.mxu0 %v57_v14  ;;  %v149_v21 = vld [vmem:[%s1197_s1 + $0x3a0] sm:$0xff]  ;;  %223 = vmatpush.msra.mxu2 %v119_v16  ;;  %v158_v10 = vld [vmem:[%s1197_s1 + $0x3e8] sm:$0xff] }
   0xb   :  { %v55_v18 = vld [vmem:[%s1197_s1 + $0xb0] sm:$0xff]  ;;  %193 = vmatpush.msra.mxu1 %v89_v15  ;;  %252 = vmatpush.msra.mxu3 %v151_v17  ;;  %v53_v22 = vld [vmem:[%s1197_s1 + $0xa0] sm:$0xff]  ;;  %v62_v11 = vld [vmem:[%s1197_s1 + $0xe8] sm:$0xff] }
   0xc   :  { %v87_v19 = vld [vmem:[%s1197_s1 + $0x1b0] sm:$0xff]  ;;  %v85_v23 = vld [vmem:[%s1197_s1 + $0x1a0] sm:$0xff]  ;;  %165 = vmatpush.msra.mxu0 %v55_v18  ;;  %224 = vmatpush.msra.mxu2 %v117_v20  ;;  %v94_v12 = vld [vmem:[%s1197_s1 + $0x1e8] sm:$0xff] }
   0xd   :  { %194 = vmatpush.msra.mxu1 %v87_v19  ;;  %v115_v24 = vld [vmem:[%s1197_s1 + $0x290] sm:$0xff]  ;;  %253 = vmatpush.msra.mxu3 %v149_v21  ;;  %v113_v28 = vld [vmem:[%s1197_s1 + $0x280] sm:$0xff]  ;;  %v122_v13 = vld [vmem:[%s1197_s1 + $0x2c8] sm:$0xff] }
   0xe   :  { %v147_v25 = vld [vmem:[%s1197_s1 + $0x390] sm:$0xff]  ;;  %166 = vmatpush.msra.mxu0 %v53_v22  ;;  %v145_v29 = vld [vmem:[%s1197_s1 + $0x380] sm:$0xff]  ;;  %225 = vmatpush.msra.mxu2 %v115_v24  ;;  %v156_v14 = vld [vmem:[%s1197_s1 + $0x3d8] sm:$0xff] }
   0xf   :  { %v51_v26 = vld [vmem:[%s1197_s1 + $0x90] sm:$0xff]  ;;  %195 = vmatpush.msra.mxu1 %v85_v23  ;;  %254 = vmatpush.msra.mxu3 %v147_v25  ;;  %v49_v30 = vld [vmem:[%s1197_s1 + $0x80] sm:$0xff]  ;;  %v60_v16 = vld [vmem:[%s1197_s1 + $0xd8] sm:$0xff] }
  0x10   :  { %v83_v27 = vld [vmem:[%s1197_s1 + $0x190] sm:$0xff]  ;;  %v81_v31 = vld [vmem:[%s1197_s1 + $0x180] sm:$0xff]  ;;  %167 = vmatpush.msra.mxu0 %v51_v26  ;;  %226 = vmatpush.msra.mxu2 %v113_v28  ;;  %v92_v17 = vld [vmem:[%s1197_s1 + $0x1d8] sm:$0xff] }
  0x11   :  { %196 = vmatpush.msra.mxu1 %v83_v27  ;;  %v111_v32 = vld [vmem:[%s1197_s1 + $0x270] sm:$0xff]  ;;  %255 = vmatpush.msra.mxu3 %v145_v29  ;;  %v109_v36 = vld [vmem:[%s1197_s1 + $0x260] sm:$0xff]  ;;  %v120_v18 = vld [vmem:[%s1197_s1 + $0x2b8] sm:$0xff] }
  0x12   :  { %v143_v33 = vld [vmem:[%s1197_s1 + $0x370] sm:$0xff]  ;;  %168 = vmatpush.msra.mxu0 %v49_v30  ;;  %v141_v37 = vld [vmem:[%s1197_s1 + $0x360] sm:$0xff]  ;;  %227 = vmatpush.msra.mxu2 %v111_v32  ;;  %v154_v19 = vld [vmem:[%s1197_s1 + $0x3c8] sm:$0xff] }
  0x13   :  { %v47_v34 = vld [vmem:[%s1197_s1 + $0x70] sm:$0xff]  ;;  %197 = vmatpush.msra.mxu1 %v81_v31  ;;  %256 = vmatpush.msra.mxu3 %v143_v33  ;;  %v45_v38 = vld [vmem:[%s1197_s1 + $0x60] sm:$0xff]  ;;  %v836_v20 = vld [vmem:[%s1198_s0 + $0x38] sm:$0xff] }
  0x14   :  { %v79_v35 = vld [vmem:[%s1197_s1 + $0x170] sm:$0xff]  ;;  %v77_v39 = vld [vmem:[%s1197_s1 + $0x160] sm:$0xff]  ;;  %169 = vmatpush.msra.mxu0 %v47_v34  ;;  %228 = vmatpush.msra.mxu2 %v109_v36  ;;  %v58_v21 = vld [vmem:[%s1197_s1 + $0xc8] sm:$0xff] }
  0x15   :  { %198 = vmatpush.msra.mxu1 %v79_v35  ;;  %v107_v40 = vld [vmem:[%s1197_s1 + $0x250] sm:$0xff]  ;;  %257 = vmatpush.msra.mxu3 %v141_v37  ;;  %v105_v44 = vld [vmem:[%s1197_s1 + $0x240] sm:$0xff]  ;;  %v90_v22 = vld [vmem:[%s1197_s1 + $0x1c8] sm:$0xff] }
  0x16   :  { %v139_v41 = vld [vmem:[%s1197_s1 + $0x350] sm:$0xff]  ;;  %170 = vmatpush.msra.mxu0 %v45_v38  ;;  %v137_v45 = vld [vmem:[%s1197_s1 + $0x340] sm:$0xff]  ;;  %229 = vmatpush.msra.mxu2 %v107_v40  ;;  %v118_v23 = vld [vmem:[%s1197_s1 + $0x2a8] sm:$0xff] }
  0x17   :  { %v43_v42 = vld [vmem:[%s1197_s1 + $0x50] sm:$0xff]  ;;  %199 = vmatpush.msra.mxu1 %v77_v39  ;;  %258 = vmatpush.msra.mxu3 %v139_v41  ;;  %v41_v46 = vld [vmem:[%s1197_s1 + $0x40] sm:$0xff]  ;;  %v152_v24 = vld [vmem:[%s1197_s1 + $0x3b8] sm:$0xff] }
  0x18   :  { %v75_v43 = vld [vmem:[%s1197_s1 + $0x150] sm:$0xff]  ;;  %v73_v47 = vld [vmem:[%s1197_s1 + $0x140] sm:$0xff]  ;;  %171 = vmatpush.msra.mxu0 %v43_v42  ;;  %230 = vmatpush.msra.mxu2 %v105_v44  ;;  %v859_v26 = vld [vmem:[%s1198_s0 + $0x28] sm:$0xff] }
  0x19   :  { %200 = vmatpush.msra.mxu1 %v75_v43  ;;  %v103_v48 = vld [vmem:[%s1197_s1 + $0x230] sm:$0xff]  ;;  %259 = vmatpush.msra.mxu3 %v137_v45  ;;  %v101_v52 = vld [vmem:[%s1197_s1 + $0x220] sm:$0xff]  ;;  %v56_v27 = vld [vmem:[%s1197_s1 + $0xb8] sm:$0xff] }
  0x1a   :  { %v135_v49 = vld [vmem:[%s1197_s1 + $0x330] sm:$0xff]  ;;  %172 = vmatpush.msra.mxu0 %v41_v46  ;;  %v133_v53 = vld [vmem:[%s1197_s1 + $0x320] sm:$0xff]  ;;  %231 = vmatpush.msra.mxu2 %v103_v48  ;;  %v88_v28 = vld [vmem:[%s1197_s1 + $0x1b8] sm:$0xff] }
  0x1b   :  { %v39_v50 = vld [vmem:[%s1197_s1 + $0x30] sm:$0xff]  ;;  %201 = vmatpush.msra.mxu1 %v73_v47  ;;  %260 = vmatpush.msra.mxu3 %v135_v49  ;;  %v37_v54 = vld [vmem:[%s1197_s1 + $0x20] sm:$0xff]  ;;  %v116_v29 = vld [vmem:[%s1197_s1 + $0x298] sm:$0xff] }
  0x1c   :  { %v71_v51 = vld [vmem:[%s1197_s1 + $0x130] sm:$0xff]  ;;  %v69_v55 = vld [vmem:[%s1197_s1 + $0x120] sm:$0xff]  ;;  %173 = vmatpush.msra.mxu0 %v39_v50  ;;  %232 = vmatpush.msra.mxu2 %v101_v52  ;;  %v150_v30 = vld [vmem:[%s1197_s1 + $0x3a8] sm:$0xff] }
  0x1d   :  { %202 = vmatpush.msra.mxu1 %v71_v51  ;;  %v99_v56 = vld [vmem:[%s1197_s1 + $0x210] sm:$0xff]  ;;  %261 = vmatpush.msra.mxu3 %v133_v53  ;;  %v97_v60 = vld [vmem:[%s1197_s1 + $0x200] sm:$0xff]  ;;  %v54_v31 = vld [vmem:[%s1197_s1 + $0xa8] sm:$0xff] }
  0x1e   :  { %v131_v57 = vld [vmem:[%s1197_s1 + $0x310] sm:$0xff]  ;;  %174 = vmatpush.msra.mxu0 %v37_v54  ;;  %v129_v61 = vld [vmem:[%s1197_s1 + $0x300] sm:$0xff]  ;;  %233 = vmatpush.msra.mxu2 %v99_v56  ;;  %v86_v32 = vld [vmem:[%s1197_s1 + $0x1a8] sm:$0xff] }
  0x1f   :  { %v35_v58 = vld [vmem:[%s1197_s1 + $0x10] sm:$0xff]  ;;  %203 = vmatpush.msra.mxu1 %v69_v55  ;;  %262 = vmatpush.msra.mxu3 %v131_v57  ;;  %v33_v2 = vld [vmem:[%s1197_s1] sm:$0xff]  ;;  %v114_v33 = vld [vmem:[%s1197_s1 + $0x288] sm:$0xff] }
  0x20   :  { %v67_v59 = vld [vmem:[%s1197_s1 + $0x110] sm:$0xff]  ;;  %175 = vmatpush.msra.mxu0 %v35_v58  ;;  %234 = vmatpush.msra.mxu2 %v97_v60  ;;  %v65_v3 = vld [vmem:[%s1197_s1 + $0x100] sm:$0xff]  ;;  %v148_v34 = vld [vmem:[%s1197_s1 + $0x398] sm:$0xff] }
  0x21   :  { %v755_v62 = vld [vmem:[%s1198_s0 + $0x10] sm:$0xff]  ;;  %204 = vmatpush.msra.mxu1 %v67_v59  ;;  %263 = vmatpush.msra.mxu3 %v129_v61  ;;  %v782_v5 = vld [vmem:[%s1198_s0] sm:$0xff]  ;;  %v52_v36 = vld [vmem:[%s1197_s1 + $0x98] sm:$0xff] }
  0x22   :  { %235 = vmatmul.f32.vlgmr.msra.gmra.mxu2 %v755_v62  ;;  %264 = vmatmul.f32.vlgmr.msra.gmra.mxu3 %v760_v63  ;;  %v818_v15 = vld [vmem:[%s1198_s0 + $0x30] sm:$0xff]  ;;  %v853_v25 = vld [vmem:[%s1198_s0 + $0x20] sm:$0xff]  ;;  %v84_v37 = vld [vmem:[%s1197_s1 + $0x198] sm:$0xff] }
  0x23   :  { %335 = vmatpush.msrb.mxu2 %v128_v0  ;;  %364 = vmatpush.msrb.mxu3 %v160_v1  ;;  %v890_v35 = vld [vmem:[%s1198_s0 + $0x50] sm:$0xff]  ;;  %v112_v38 = vld [vmem:[%s1197_s1 + $0x278] sm:$0xff]  ;;  %v146_v39 = vld [vmem:[%s1197_s1 + $0x388] sm:$0xff] }
  0x24   :  { %176 = vmatpush.msra.mxu0 %v33_v2  ;;  %205 = vmatpush.msra.mxu1 %v65_v3  ;;  %v908_v40 = vld [vmem:[%s1198_s0 + $0x58] sm:$0xff]  ;;  %v50_v41 = vld [vmem:[%s1197_s1 + $0x88] sm:$0xff]  ;;  %v925_v45 = vld [vmem:[%s1198_s0 + $0x40] sm:$0xff] }
  0x25   :  { %336 = vmatpush.msrb.mxu2 %v126_v4  ;;  %177 = vmatmul.f32.vlgmr.msra.gmra.mxu0 %v782_v5  ;;  %v82_v42 = vld [vmem:[%s1197_s1 + $0x188] sm:$0xff]  ;;  %v144_v44 = vld [vmem:[%s1197_s1 + $0x378] sm:$0xff]  ;;  %v962_v55 = vld [vmem:[%s1198_s0 + $0x70] sm:$0xff] }
  0x26   :  { %206 = vmatmul.f32.vlgmr.msra.gmra.mxu1 %v787_v6  ;;  %277 = vmatpush.msrb.mxu0 %v64_v7  ;;  %v110_v43 = vld [vmem:[%s1197_s1 + $0x268] sm:$0xff]  ;;  %v48_v47 = vld [vmem:[%s1197_s1 + $0x78] sm:$0xff]  ;;  %v29_v3 = vld [vmem:[%s1198_s0 + $0x60] sm:$0xff] }
  0x27   :  { %306 = vmatpush.msrb.mxu1 %v96_v8  ;;  %337 = vmatpush.msrb.mxu2 %v124_v9  ;;  %v931_v46 = vld [vmem:[%s1198_s0 + $0x48] sm:$0xff]  ;;  %v80_v48 = vld [vmem:[%s1197_s1 + $0x178] sm:$0xff] }
  0x28   :  { %365 = vmatpush.msrb.mxu3 %v158_v10  ;;  %278 = vmatpush.msrb.mxu0 %v62_v11  ;;  %v108_v49 = vld [vmem:[%s1197_s1 + $0x258] sm:$0xff]  ;;  %v142_v50 = vld [vmem:[%s1197_s1 + $0x368] sm:$0xff] }
  0x29   :  { %307 = vmatpush.msrb.mxu1 %v94_v12  ;;  %338 = vmatpush.msrb.mxu2 %v122_v13  ;;  %v46_v51 = vld [vmem:[%s1197_s1 + $0x68] sm:$0xff]  ;;  %v140_v54 = vld [vmem:[%s1197_s1 + $0x358] sm:$0xff] }
  0x2a   :  { %366 = vmatpush.msrb.mxu3 %v156_v14  ;;  %238 = vmatmul.f32.gmra.mxu2 %v818_v15  ;;  %v78_v52 = vld [vmem:[%s1197_s1 + $0x168] sm:$0xff]  ;;  %v44_v56 = vld [vmem:[%s1197_s1 + $0x58] sm:$0xff] }
  0x2b   :  { %279 = vmatpush.msrb.mxu0 %v60_v16  ;;  %308 = vmatpush.msrb.mxu1 %v92_v17  ;;  %v106_v53 = vld [vmem:[%s1197_s1 + $0x248] sm:$0xff]  ;;  %v76_v57 = vld [vmem:[%s1197_s1 + $0x158] sm:$0xff] }
  0x2c   :  { %339 = vmatpush.msrb.mxu2 %v120_v18  ;;  %367 = vmatpush.msrb.mxu3 %v154_v19  ;;  %v104_v58 = vld [vmem:[%s1197_s1 + $0x238] sm:$0xff]  ;;  %v138_v59 = vld [vmem:[%s1197_s1 + $0x348] sm:$0xff] }
  0x2d   :  { %267 = vmatmul.f32.gmra.mxu3 %v836_v20  ;;  %280 = vmatpush.msrb.mxu0 %v58_v21  ;;  %v32_v60 = vld [vmem:[%s1198_s0 + $0x78] sm:$0xff]  ;;  %v42_v61 = vld [vmem:[%s1197_s1 + $0x48] sm:$0xff] }
  0x2e   :  { %309 = vmatpush.msrb.mxu1 %v90_v22  ;;  %340 = vmatpush.msrb.mxu2 %v118_v23  ;;  %v74_v0 = vld [vmem:[%s1197_s1 + $0x148] sm:$0xff]  ;;  %v136_v2 = vld [vmem:[%s1197_s1 + $0x338] sm:$0xff]  ;;  %v409_v23 = vld [vmem:[%s1199_s2 + $0x40] sm:$0xff] }
  0x2f   :  { %368 = vmatpush.msrb.mxu3 %v152_v24  ;;  %180 = vmatmul.f32.gmra.mxu0 %v853_v25  ;;  %v102_v1 = vld [vmem:[%s1197_s1 + $0x228] sm:$0xff]  ;;  %v40_v7 = vld [vmem:[%s1197_s1 + $0x38] sm:$0xff] }
  0x30   :  { %209 = vmatmul.f32.gmra.mxu1 %v859_v26  ;;  %281 = vmatpush.msrb.mxu0 %v56_v27  ;;  %v30_v4 = vld [vmem:[%s1198_s0 + $0x68] sm:$0xff]  ;;  %v72_v8 = vld [vmem:[%s1197_s1 + $0x138] sm:$0xff] }
  0x31   :  { %310 = vmatpush.msrb.mxu1 %v88_v28  ;;  %341 = vmatpush.msrb.mxu2 %v116_v29  ;;  %v100_v9 = vld [vmem:[%s1197_s1 + $0x218] sm:$0xff]  ;;  %v134_v10 = vld [vmem:[%s1197_s1 + $0x328] sm:$0xff] }
  0x32   :  { %369 = vmatpush.msrb.mxu3 %v150_v30  ;;  %282 = vmatpush.msrb.mxu0 %v54_v31  ;;  %v38_v11 = vld [vmem:[%s1197_s1 + $0x28] sm:$0xff]  ;;  %v132_v14 = vld [vmem:[%s1197_s1 + $0x318] sm:$0xff]  ;;  %v405_v30 = vld [vmem:[%s1199_s2 + $0x20] sm:$0xff] }
  0x33   :  { %311 = vmatpush.msrb.mxu1 %v86_v32  ;;  %342 = vmatpush.msrb.mxu2 %v114_v33  ;;  %v70_v12 = vld [vmem:[%s1197_s1 + $0x128] sm:$0xff]  ;;  %v36_v16 = vld [vmem:[%s1197_s1 + $0x18] sm:$0xff]  ;;  %v403_v33 = vld [vmem:[%s1199_s2 + $0x10] sm:$0xff] }
  0x34   :  { %370 = vmatpush.msrb.mxu3 %v148_v34  ;;  %241 = vmatmul.f32.gmra.mxu2 %v890_v35  ;;  %v98_v13 = vld [vmem:[%s1197_s1 + $0x208] sm:$0xff]  ;;  %v68_v17 = vld [vmem:[%s1197_s1 + $0x118] sm:$0xff] }
  0x35   :  { %283 = vmatpush.msrb.mxu0 %v52_v36  ;;  %312 = vmatpush.msrb.mxu1 %v84_v37  ;;  %v130_v18 = vld [vmem:[%s1197_s1 + $0x308] sm:$0xff]  ;;  %v408_v24 = vld [vmem:[%s1199_s2 + $0x38] sm:$0xff] }
  0x36   :  { %343 = vmatpush.msrb.mxu2 %v112_v38  ;;  %371 = vmatpush.msrb.mxu3 %v146_v39  ;;  %v34_v19 = vld [vmem:[%s1197_s1 + $0x8] sm:$0xff]  ;;  %v404_v32 = vld [vmem:[%s1199_s2 + $0x18] sm:$0xff]  ;;  %v401_v38 = vld [vmem:[%s1199_s2] sm:$0xff] }
  0x37   :  { %270 = vmatmul.f32.gmra.mxu3 %v908_v40  ;;  %284 = vmatpush.msrb.mxu0 %v50_v41  ;;  %v66_v21 = vld [vmem:[%s1197_s1 + $0x108] sm:$0xff]  ;;  %v432_v39 = vld [vmem:[%s1199_s2 + $0xf8] sm:$0xff] }
  0x38   :  { %313 = vmatpush.msrb.mxu1 %v82_v42  ;;  %344 = vmatpush.msrb.mxu2 %v110_v43  ;;  %v410_v22 = vld [vmem:[%s1199_s2 + $0x48] sm:$0xff]  ;;  %v429_v43 = vld [vmem:[%s1199_s2 + $0xe0] sm:$0xff] }
  0x39   :  { %372 = vmatpush.msrb.mxu3 %v144_v44  ;;  %183 = vmatmul.f32.gmra.mxu0 %v925_v45  ;;  %v406_v28 = vld [vmem:[%s1199_s2 + $0x28] sm:$0xff] }
  0x3a   :  { %212 = vmatmul.f32.gmra.mxu1 %v931_v46  ;;  %285 = vmatpush.msrb.mxu0 %v48_v47  ;;  %v402_v34 = vld [vmem:[%s1199_s2 + $0x8] sm:$0xff]  ;;  %v428_v47 = vld [vmem:[%s1199_s2 + $0xd8] sm:$0xff] }
  0x3b   :  { %314 = vmatpush.msrb.mxu1 %v80_v48  ;;  %345 = vmatpush.msrb.mxu2 %v108_v49  ;;  %v430_v42 = vld [vmem:[%s1199_s2 + $0xe8] sm:$0xff]  ;;  %v427_v48 = vld [vmem:[%s1199_s2 + $0xd0] sm:$0xff] }
  0x3c   :  { %373 = vmatpush.msrb.mxu3 %v142_v50  ;;  %286 = vmatpush.msrb.mxu0 %v46_v51  ;;  %v426_v50 = vld [vmem:[%s1199_s2 + $0xc8] sm:$0xff] }
  0x3d   :  { %315 = vmatpush.msrb.mxu1 %v78_v52  ;;  %346 = vmatpush.msrb.mxu2 %v106_v53  ;;  %v425_v52 = vld [vmem:[%s1199_s2 + $0xc0] sm:$0xff] }
  0x3e   :  { %374 = vmatpush.msrb.mxu3 %v140_v54  ;;  %244 = vmatmul.f32.gmra.mxu2 %v962_v55 }
  0x3f   :  { %287 = vmatpush.msrb.mxu0 %v44_v56  ;;  %316 = vmatpush.msrb.mxu1 %v76_v57  ;;  %v423_v56 = vld [vmem:[%s1199_s2 + $0xb0] sm:$0xff] }
  0x40   :  { %347 = vmatpush.msrb.mxu2 %v104_v58  ;;  %375 = vmatpush.msrb.mxu3 %v138_v59 }
  0x41   :  { %273 = vmatmul.f32.gmra.mxu3 %v32_v60  ;;  %288 = vmatpush.msrb.mxu0 %v42_v61 }
  0x42   :  { %317 = vmatpush.msrb.mxu1 %v74_v0  ;;  %348 = vmatpush.msrb.mxu2 %v102_v1 }
  0x43   :  { %376 = vmatpush.msrb.mxu3 %v136_v2  ;;  %186 = vmatmul.f32.gmra.mxu0 %v29_v3  ;;  %v422_v2 = vld [vmem:[%s1199_s2 + $0xa8] sm:$0xff] }
  0x44   :  { %215 = vmatmul.f32.gmra.mxu1 %v30_v4  ;;  %289 = vmatpush.msrb.mxu0 %v40_v7 }
  0x45   :  { %318 = vmatpush.msrb.mxu1 %v72_v8  ;;  %349 = vmatpush.msrb.mxu2 %v100_v9  ;;  %v421_v8 = vld [vmem:[%s1199_s2 + $0xa0] sm:$0xff] }
  0x46   :  { %377 = vmatpush.msrb.mxu3 %v134_v10  ;;  %290 = vmatpush.msrb.mxu0 %v38_v11 }
  0x47   :  { %319 = vmatpush.msrb.mxu1 %v70_v12  ;;  %350 = vmatpush.msrb.mxu2 %v98_v13  ;;  %v420_v12 = vld [vmem:[%s1199_s2 + $0x98] sm:$0xff] }
  0x48   :  { %378 = vmatpush.msrb.mxu3 %v132_v14  ;;  %291 = vmatpush.msrb.mxu0 %v36_v16 }
  0x49   :  { %320 = vmatpush.msrb.mxu1 %v68_v17  ;;  %351 = vmatmul.f32.vlgmr.msrb.gmra.mxu2 %v755_v62  ;;  %v416_v62 = vld [vmem:[%s1199_s2 + $0x78] sm:$0xff] }
  0x4a   :  { %379 = vmatpush.msrb.mxu3 %v130_v18  ;;  %292 = vmatpush.msrb.mxu0 %v34_v19  ;;  %v419_v18 = vld [vmem:[%s1199_s2 + $0x90] sm:$0xff] }
  0x4b   :  { %321 = vmatpush.msrb.mxu1 %v66_v21  ;;  %380 = vmatmul.f32.vlgmr.msrb.gmra.mxu3 %v760_v63  ;;  %v415_v63 = vld [vmem:[%s1199_s2 + $0x70] sm:$0xff]  ;;  %v418_v21 = vld [vmem:[%s1199_s2 + $0x88] sm:$0xff] }
  0x4c   :  { %293 = vmatmul.f32.vlgmr.msrb.gmra.mxu0 %v782_v5  ;;  %322 = vmatmul.f32.vlgmr.msrb.gmra.mxu1 %v787_v6  ;;  %v414_v5 = vld [vmem:[%s1199_s2 + $0x68] sm:$0xff]  ;;  %v413_v6 = vld [vmem:[%s1199_s2 + $0x60] sm:$0xff] }
  0x4d   :  { %433 = vmatpush.msra.mxu0 %v416_v62  ;;  %453 = vmatpush.msra.mxu1 %v432_v39 }
  0x4f   :  { %434 = vmatpush.msra.mxu0 %v415_v63 }
  0x51   :  { %354 = vmatmul.f32.gmra.mxu2 %v818_v15  ;;  %435 = vmatpush.msra.mxu0 %v414_v5  ;;  %v412_v15 = vld [vmem:[%s1199_s2 + $0x58] sm:$0xff]  ;;  %v417_v5 = vld [vmem:[%s1199_s2 + $0x80] sm:$0xff] }
  0x53   :  { %383 = vmatmul.f32.gmra.mxu3 %v836_v20  ;;  %436 = vmatpush.msra.mxu0 %v413_v6  ;;  %v411_v20 = vld [vmem:[%s1199_s2 + $0x50] sm:$0xff] }
  0x54   :  { %296 = vmatmul.f32.gmra.mxu0 %v853_v25  ;;  %325 = vmatmul.f32.gmra.mxu1 %v859_v26  ;;  %v407_v25 = vld [vmem:[%s1199_s2 + $0x30] sm:$0xff] }
  0x55   :  { %437 = vmatpush.msra.mxu0 %v412_v15 }
  0x57   :  { %438 = vmatpush.msra.mxu0 %v411_v20 }
  0x59   :  { %357 = vmatmul.f32.gmra.mxu2 %v890_v35  ;;  %439 = vmatpush.msra.mxu0 %v410_v22 }
  0x5b   :  { %386 = vmatmul.f32.gmra.mxu3 %v908_v40  ;;  %440 = vmatpush.msra.mxu0 %v409_v23  ;;  %v431_v40 = vld [vmem:[%s1199_s2 + $0xf0] sm:$0xff] }
  0x5c   :  { %299 = vmatmul.f32.gmra.mxu0 %v925_v45  ;;  %328 = vmatmul.f32.gmra.mxu1 %v931_v46 }
  0x5d   :  { %441 = vmatpush.msra.mxu0 %v408_v24  ;;  %454 = vmatpush.msra.mxu1 %v431_v40 }
  0x5f   :  { %442 = vmatpush.msra.mxu0 %v407_v25  ;;  %455 = vmatpush.msra.mxu1 %v430_v42 }
  0x61   :  { %360 = vmatmul.f32.gmra.mxu2 %v962_v55  ;;  %443 = vmatpush.msra.mxu0 %v406_v28  ;;  %v424_v55 = vld [vmem:[%s1199_s2 + $0xb8] sm:$0xff] }
  0x62   :  { %456 = vmatpush.msra.mxu1 %v429_v43 }
  0x63   :  { %389 = vmatmul.f32.gmra.mxu3 %v32_v60  ;;  %444 = vmatpush.msra.mxu0 %v405_v30 }
  0x64   :  { %302 = vmatmul.f32.gmra.mxu0 %v29_v3  ;;  %331 = vmatmul.f32.gmra.mxu1 %v30_v4 }
  0x65   :  { %445 = vmatpush.msra.mxu0 %v404_v32  ;;  %457 = vmatpush.msra.mxu1 %v428_v47 }
  0x67   :  { %446 = vmatpush.msra.mxu0 %v403_v33  ;;  %458 = vmatpush.msra.mxu1 %v427_v48  ;;  %v489_v48 = vld [vmem:[%s1200_s3 + $0x78] sm:$0xff] }
  0x68   :  { %490 = vmatpush.msra.mxu2 %v489_v48 }
  0x69   :  { %447 = vmatpush.msra.mxu0 %v402_v34  ;;  %459 = vmatpush.msra.mxu1 %v426_v50  ;;  %v487_v50 = vld [vmem:[%s1200_s3 + $0x68] sm:$0xff] }
  0x6b   :  { %448 = vmatpush.msra.mxu0 %v401_v38  ;;  %460 = vmatpush.msra.mxu1 %v425_v52  ;;  %v485_v52 = vld [vmem:[%s1200_s3 + $0x58] sm:$0xff] }
  0x6d   :  { %461 = vmatpush.msra.mxu1 %v424_v55  ;;  %v482_v55 = vld [vmem:[%s1200_s3 + $0x40] sm:$0xff] }
  0x6f   :  { %462 = vmatpush.msra.mxu1 %v423_v56  ;;  %v481_v56 = vld [vmem:[%s1200_s3 + $0x38] sm:$0xff] }
  0x71   :  { %463 = vmatpush.msra.mxu1 %v422_v2 }
  0x73   :  { %464 = vmatpush.msra.mxu1 %v421_v8 }
  0x75   :  { %465 = vmatpush.msra.mxu1 %v420_v12 }
  0x77   :  { %466 = vmatpush.msra.mxu1 %v419_v18 }
  0x79   :  { %467 = vmatpush.msra.mxu1 %v418_v21 }
  0x7b   :  { %468 = vmatpush.msra.mxu1 %v417_v5 }
  0xa2   :  { %v178_v26 = vpop.f32.mrf.mxu0 }
  0xa3   :  { %v207_v27 = vpop.f32.mrf.mxu1 }
  0xa4   :  { %v208_v53 = vadd.f32 %v207_v27, %v178_v26 }
  0xa5   :  { %v236_v29 = vpop.f32.mrf.mxu2  ;;  %v265_v31 = vpop.f32.mrf.mxu3 }
  0xa6   :  { %v237_v61 = vadd.f32 %v236_v29, %v208_v53  ;;  %v484_v53 = vld [vmem:[%s1200_s3 + $0x50] sm:$0xff] }
  0xa8   :  { %v266_v9 = vadd.f32 %v265_v31, %v237_v61  ;;  %v476_v61 = vld [vmem:[%s1200_s3 + $0x10] sm:$0xff] }
  0xac   :  { %v181_v35 = vpop.f32.mrf.mxu0 }
  0xad   :  { %v210_v36 = vpop.f32.mrf.mxu1  ;;  %v239_v37 = vpop.f32.mrf.mxu2 }
  0xae   :  { %v211_v51 = vadd.f32 %v210_v36, %v181_v35 }
  0xb0   :  { %v268_v41 = vpop.f32.mrf.mxu3  ;;  %v240_v57 = vadd.f32 %v239_v37, %v211_v51  ;;  %v486_v51 = vld [vmem:[%s1200_s3 + $0x60] sm:$0xff] }
  0xb2   :  { %v269_v3 = vadd.f32 %v268_v41, %v240_v57  ;;  %v480_v57 = vld [vmem:[%s1200_s3 + $0x30] sm:$0xff] }
  0xb4   :  { %v393_v13 = vmax.f32 %v266_v9, %v269_v3 }
  0xb6   :  { %v184_v44 = vpop.f32.mrf.mxu0 }
  0xb7   :  { %v213_v45 = vpop.f32.mrf.mxu1  ;;  %v242_v46 = vpop.f32.mrf.mxu2 }
  0xb8   :  { %v214_v54 = vadd.f32 %v213_v45, %v184_v44 }
  0xba   :  { %v271_v49 = vpop.f32.mrf.mxu3  ;;  %v243_v0 = vadd.f32 %v242_v46, %v214_v54  ;;  %v483_v54 = vld [vmem:[%s1200_s3 + $0x48] sm:$0xff] }
  0xbc   :  { %v272_v10 = vadd.f32 %v271_v49, %v243_v0  ;;  %v488_v49 = vld [vmem:[%s1200_s3 + $0x70] sm:$0xff]  ;;  %v475_v0 = vld [vmem:[%s1200_s3 + $0x8] sm:$0xff] }
  0xbd   :  { %491 = vmatpush.msra.mxu2 %v488_v49 }
  0xbf   :  { %492 = vmatpush.msra.mxu2 %v487_v50 }
  0xc0   :  { %v187_v58 = vpop.f32.mrf.mxu0 }
  0xc1   :  { %v216_v59 = vpop.f32.mrf.mxu1  ;;  %v245_v60 = vpop.f32.mrf.mxu2  ;;  %493 = vmatpush.msra.mxu2 %v486_v51 }
  0xc2   :  { %v217_v1 = vadd.f32 %v216_v59, %v187_v58  ;;  %v479_v58 = vld [vmem:[%s1200_s3 + $0x28] sm:$0xff]  ;;  %v478_v59 = vld [vmem:[%s1200_s3 + $0x20] sm:$0xff] }
  0xc3   :  { %494 = vmatpush.msra.mxu2 %v485_v52 }
  0xc4   :  { %v246_v4 = vadd.f32 %v245_v60, %v217_v1  ;;  %v274_v7 = vpop.f32.mrf.mxu3  ;;  %v477_v60 = vld [vmem:[%s1200_s3 + $0x18] sm:$0xff]  ;;  %v474_v1 = vld [vmem:[%s1200_s3] sm:$0xff] }
  0xc5   :  { %495 = vmatpush.msra.mxu2 %v484_v53 }
  0xc6   :  { %v275_v11 = vadd.f32 %v274_v7, %v246_v4 }
  0xc7   :  { %496 = vmatpush.msra.mxu2 %v483_v54 }
  0xc8   :  { %v395_v14 = vmax.f32 %v272_v10, %v275_v11 }
  0xc9   :  { %v294_v16 = vpop.f32.mrf.mxu0  ;;  %v323_v17 = vpop.f32.mrf.mxu1  ;;  %497 = vmatpush.msra.mxu2 %v482_v55 }
  0xca   :  { %v397_v19 = vmax.f32 %v393_v13, %v395_v14  ;;  %v324_v29 = vadd.f32 %v323_v17, %v294_v16 }
  0xcb   :  { %498 = vmatpush.msra.mxu2 %v481_v56 }
  0xcc   :  { %v399_v62 = vmax.f32 %v397_v19, 0.0  ;;  %v352_v63 = vpop.f32.mrf.mxu2 }
  0xcd   :  { %v353_v35 = vadd.f32 %v352_v63, %v324_v29  ;;  %499 = vmatpush.msra.mxu2 %v480_v57 }
  0xce   :  { %v381_v6 = vpop.f32.mrf.mxu3  ;;  %449 = vmatmul.f32.vlgmr.msra.gmra.mxu0 %v399_v62 }
  0xcf   :  { %v382_v41 = vadd.f32 %v381_v6, %v353_v35  ;;  %500 = vmatpush.msra.mxu2 %v479_v58 }
  0xd1   :  { %v297_v15 = vpop.f32.mrf.mxu0  ;;  %v326_v20 = vpop.f32.mrf.mxu1  ;;  %501 = vmatpush.msra.mxu2 %v478_v59 }
  0xd2   :  { %v327_v27 = vadd.f32 %v326_v20, %v297_v15 }
  0xd3   :  { %502 = vmatpush.msra.mxu2 %v477_v60 }
  0xd4   :  { %v355_v22 = vpop.f32.mrf.mxu2 }
  0xd5   :  { %v356_v31 = vadd.f32 %v355_v22, %v327_v27  ;;  %503 = vmatpush.msra.mxu2 %v476_v61 }
  0xd6   :  { %v384_v23 = vpop.f32.mrf.mxu3 }
  0xd7   :  { %v385_v38 = vadd.f32 %v384_v23, %v356_v31  ;;  %504 = vmatpush.msra.mxu2 %v475_v0 }
  0xd9   :  { %v300_v24 = vpop.f32.mrf.mxu0  ;;  %v329_v25 = vpop.f32.mrf.mxu1  ;;  %v394_v44 = vmax.f32 %v382_v41, %v385_v38  ;;  %505 = vmatpush.msra.mxu2 %v474_v1 }
  0xda   :  { %v330_v30 = vadd.f32 %v329_v25, %v300_v24 }
  0xdc   :  { %v358_v26 = vpop.f32.mrf.mxu2 }
  0xdd   :  { %v359_v36 = vadd.f32 %v358_v26, %v330_v30 }
  0xde   :  { %v387_v28 = vpop.f32.mrf.mxu3 }
  0xdf   :  { %v388_v42 = vadd.f32 %v387_v28, %v359_v36 }
  0xe1   :  { %v303_v32 = vpop.f32.mrf.mxu0  ;;  %v332_v33 = vpop.f32.mrf.mxu1 }
  0xe2   :  { %v333_v34 = vadd.f32 %v332_v33, %v303_v32 }
  0xe4   :  { %v361_v37 = vpop.f32.mrf.mxu2 }
  0xe5   :  { %v362_v39 = vadd.f32 %v361_v37, %v333_v34 }
  0xe6   :  { %v390_v40 = vpop.f32.mrf.mxu3 }
  0xe7   :  { %v391_v43 = vadd.f32 %v390_v40, %v362_v39 }
  0xe9   :  { %v396_v45 = vmax.f32 %v388_v42, %v391_v43 }
  0xeb   :  { %v398_v46 = vmax.f32 %v394_v44, %v396_v45 }
  0xed   :  { %v400_v47 = vmax.f32 %v398_v46, 0.0 }
  0xef   :  { %469 = vmatmul.f32.vlgmr.msra.gmra.mxu1 %v400_v47 }
 0x14b   :  { %v450_v2 = vpop.f32.mrf.mxu0 }
 0x16c   :  { %v470_v3 = vpop.f32.mrf.mxu1 }
 0x16d   :  { %v471_v4 = vadd.f32 %v470_v3, %v450_v2 }
 0x16f   :  { %v473_v7 = vmax.f32 %v471_v4, 0.0 }
 0x171   :  { %506 = vmatmul.f32.vlgmr.msra.gmra.mxu2 %v473_v7 }
 0x1f4   :  { %v507_v8 = vpop.f32.mrf.mxu2 }
 0x1f5   :  { %510 = vmax.xlane.f32.xlu0 %v507_v8 }
 0x268   :  { %v511_v9 = vpop.xlane.xlu0 %510 }
 0x269   :  { %v512_v10 = vsub.f32 %v507_v8, %v511_v9 }
 0x26b   :  { %v513_v11 = vmul.f32 1.442695, %v512_v10 }
 0x26d   :  { %537 = vpow2.f32 %v513_v11 }
 0x273   :  { %v538_v12 = vpop.eup %537 }
 0x274   :  { %515 = vadd.xlane.f32.xlu0 %v538_v12 }
 0x2e7   :  { %v516_v13 = vpop.xlane.xlu0 %515 }
 0x2e8   :  { %539 = vrcp.f32 %v516_v13  ;;  %v528_v18 = vand.u32 2147483648, %v516_v13  ;;  %v526_v21 = vand.u32 2147483647, %v516_v13  ;;  %vm522_vm1 = vweird.f32 %v516_v13 }
 0x2ea   :  { %v529_v63 = vor.u32 1.1754944e-38, %v528_v18  ;;  %vm527_vm3 = vcmp.eq.f32.partialorder %v526_v21, 8.507059e+37 }
 0x2ee   :  { %v540_v14 = vpop.eup %539 }
 0x2ef   :  { %v518_v16 = vmul.f32 %v540_v14, %v516_v13  ;;  %vm523_vm0 = vweird.f32 %v540_v14 }
 0x2f0   :  { %vm524_vm2 = vmor %vm522_vm1, %vm523_vm0 }
 0x2f1   :  { %v519_v17 = vsub.f32 1.0, %v518_v16 }
 0x2f3   :  { %v520_v19 = vmul.f32 %v540_v14, %v519_v17 }
 0x2f5   :  { %v521_v62 = vadd.f32 %v540_v14, %v520_v19 }
 0x2f7   :  { %v525_v5 = vsel %vm524_vm2, %v540_v14, %v521_v62 }
 0x2f8   :  { %v530_v6 = vsel %vm527_vm3, %v529_v63, %v525_v5 }
 0x2f9   :  { %v531_v15 = vmul.f32 %v538_v12, %v530_v6 }
 0x2fb   :  { %532 = vst [vmem:[%s1201_s4] sm:$0xff] %v531_v15 }

</bundles_post_ra>
